<compile_context>
chip_gen: v7x
topology: tpu7x:2x2x1
jax: 0.10.0
libtpu: 0.0.40
codegen_flags: <defaults>
</compile_context>

<pallas_src>
import jax
import jax.numpy as jnp
from jax.experimental import pallas as pl
from jax.experimental.pallas import tpu as pltpu

INPUT = 6
H1 = INPUT * 10   # 60
H2 = INPUT * 4    # 24
OUT = 1

# Packed parameter layout (rows aligned to sublane multiples of 8).
R_W1 = 0           # rows [0, 60)   cols [0, 6)   : W1 (60, 6)
R_W2 = 64          # rows [64, 88)  cols [0, 60)  : W2 (24, 60)
R_W3 = 88          # rows [88, 112) cols [0, 1)   : W3^T stored as column (24, 1)
P_ROWS = 112
P_COLS = 64        # >= 60; VMEM pads lanes to 128 anyway

DEFAULT_TB = 512   # batch-tile (lane) width; multiple of 128


def _mlp_kernel(x_ref, w_ref, b_ref, o_ref):
    x = x_ref[...]                                        # (6, TB)

    # Layer 1: (60, 6) @ (6, TB) -> (60, TB)
    w1 = w_ref[R_W1:R_W1 + H1, 0:INPUT]
    b1 = b_ref[R_W1:R_W1 + H1, :]                         # (60, 1) broadcast over lanes
    h1 = jnp.dot(w1, x, preferred_element_type=jnp.float32)
    h1 = jnp.maximum(h1 + b1, 0.0)

    # Layer 2: (24, 60) @ (60, TB) -> (24, TB)
    w2 = w_ref[R_W2:R_W2 + H2, 0:H1]
    b2 = b_ref[R_W2:R_W2 + H2, :]                         # (24, 1)
    h2 = jnp.dot(w2, h1, preferred_element_type=jnp.float32)
    h2 = jnp.maximum(h2 + b2, 0.0)

    # Layer 3 (24 -> 1): VPU broadcast-multiply + sublane reduce, no MXU.
    w3c = w_ref[R_W3:R_W3 + H2, 0:1]                      # (24, 1) == W3^T
    b3 = b_ref[R_W3:R_W3 + 1, :]                          # (1, 1)
    h3 = jnp.sum(w3c * h2, axis=0, keepdims=True) + b3    # (1, TB)
    o_ref[...] = jnp.maximum(h3, 0.0).astype(o_ref.dtype)


def _round_up(n, m):
    return ((n + m - 1) // m) * m


def predictor_nn_forward(x, params, *, tb=DEFAULT_TB):
    """x: (B, 6) float32.  params: dict with packed 'wbuf' (112,64) and 'bbuf' (112,1)."""
    B = x.shape[0]
    tb = min(tb, _round_up(max(B, 1), 128))               # don't oversize tiny batches
    Bp = _round_up(B, tb)

    xT = x.T                                              # (6, B) batch-on-lane
    if Bp != B:
        xT = jnp.pad(xT, ((0, 0), (0, Bp - B)))           # zero-pad ragged tail

    out = pl.pallas_call(
        _mlp_kernel,
        out_shape=jax.ShapeDtypeStruct((1, Bp), jnp.float32),
        grid=(Bp // tb,),
        in_specs=[
            pl.BlockSpec((INPUT, tb), lambda i: (0, i)),      # streamed x tile
            pl.BlockSpec((P_ROWS, P_COLS), lambda i: (0, 0)),  # resident packed weights
            pl.BlockSpec((P_ROWS, 1), lambda i: (0, 0)),       # resident packed biases
        ],
        out_specs=pl.BlockSpec((1, tb), lambda i: (0, i)),
        compiler_params=pltpu.CompilerParams(
            dimension_semantics=("parallel",),
        ),
    )(xT, params["wbuf"], params["bbuf"])

    return out[:, :B].T                                   # (B, 1)


def pack_params(w1, b1, w2, b2, w3, b3):
    """Pack PyTorch-layout (out, in) weights / (out,) biases into two padded slabs."""
    wbuf = jnp.zeros((P_ROWS, P_COLS), jnp.float32)
    wbuf = wbuf.at[R_W1:R_W1 + H1, 0:INPUT].set(w1)       # (60, 6)
    wbuf = wbuf.at[R_W2:R_W2 + H2, 0:H1].set(w2)          # (24, 60)
    wbuf = wbuf.at[R_W3:R_W3 + H2, 0:1].set(w3.T)         # (24, 1)

    bbuf = jnp.zeros((P_ROWS, 1), jnp.float32)
    bbuf = bbuf.at[R_W1:R_W1 + H1, 0].set(b1)
    bbuf = bbuf.at[R_W2:R_W2 + H2, 0].set(b2)
    bbuf = bbuf.at[R_W3:R_W3 + 1, 0].set(b3)

    return {"wbuf": wbuf, "bbuf": bbuf,
            "raw": (w1, b1, w2, b2, w3, b3)}


def init_params(key):
    """nn.Linear default init U(-1/sqrt(fan_in), +1/sqrt(fan_in)), PyTorch (out, in) layout."""
    ks = jax.random.split(key, 6)

    def linear(kw, kb, fan_in, fan_out):
        bound = 1.0 / (fan_in ** 0.5)
        w = jax.random.uniform(kw, (fan_out, fan_in), jnp.float32, -bound, bound)
        b = jax.random.uniform(kb, (fan_out,), jnp.float32, -bound, bound)
        return w, b

    w1, b1 = linear(ks[0], ks[1], INPUT, H1)
    w2, b2 = linear(ks[2], ks[3], H1, H2)
    w3, b3 = linear(ks[4], ks[5], H2, OUT)
    return pack_params(w1, b1, w2, b2, w3, b3)


def _reference(x, params):
    w1, b1, w2, b2, w3, b3 = params["raw"]
    h1 = jnp.maximum(x @ w1.T + b1, 0.0)
    h2 = jnp.maximum(h1 @ w2.T + b2, 0.0)
    return jnp.maximum(h2 @ w3.T + b3, 0.0)


if __name__ == "__main__":
    key = jax.random.PRNGKey(0)
    kx, kp = jax.random.split(key)

    B = 8
    x = jax.random.normal(kx, (B, INPUT), dtype=jnp.float32)
    params = init_params(kp)

    out = predictor_nn_forward(x, params)
    out = jax.block_until_ready(out)

    ref = _reference(x, params)
    assert out.shape == (B, OUT), out.shape
    assert jnp.allclose(out, ref, atol=1e-5, rtol=1e-5), "mismatch vs JAX reference"

    print("KERNEL_OK")
</pallas_src>

<mosaic_0001>
module attributes {stable_mosaic.version = 11 : i64} {
  func.func @_mlp_kernel(%arg0: i32, %arg1: memref<6x128xf32, #tpu.memory_space<vmem>>, %arg2: memref<112x64xf32, #tpu.memory_space<vmem>>, %arg3: memref<112x1xf32, #tpu.memory_space<vmem>>, %arg4: memref<1x128xf32, #tpu.memory_space<vmem>>) attributes {dimension_semantics = [#tpu.dimension_semantics<parallel>], iteration_bounds = array<i64: 1>, scalar_prefetch = 0 : i64, scratch_operands = 0 : i64, tpu.core_type = #tpu.core_type<tc>, window_params = [{transform_indices = @transform_0, window_bounds = array<i64: 6, 128>}, {pipeline_mode = #tpu.pipeline_mode<synchronous>, transform_indices = @transform_1, window_bounds = array<i64: 112, 64>}, {pipeline_mode = #tpu.pipeline_mode<synchronous>, transform_indices = @transform_2, window_bounds = array<i64: 112, 1>}, {transform_indices = @transform_3, window_bounds = array<i64: 1, 128>}]} {
    %c0 = arith.constant 0 : index
    %c0_0 = arith.constant 0 : index
    %0 = vector.load %arg1[%c0, %c0_0] : memref<6x128xf32, #tpu.memory_space<vmem>>, vector<6x128xf32>
    %c0_1 = arith.constant 0 : index
    %c0_2 = arith.constant 0 : index
    %1 = vector.load %arg2[%c0_1, %c0_2] : memref<112x64xf32, #tpu.memory_space<vmem>>, vector<60x6xf32>
    %c0_3 = arith.constant 0 : index
    %c0_4 = arith.constant 0 : index
    %2 = vector.load %arg3[%c0_3, %c0_4] : memref<112x1xf32, #tpu.memory_space<vmem>>, vector<60x1xf32>
    %cst = arith.constant dense<0.000000e+00> : vector<60x128xf32>
    %3 = tpu.matmul %1, %0, %cst {dimension_numbers = #tpu.dot_dimension_numbers<[1], [0], [0], [1], [0, 0, 1, 1], [], []>} : vector<60x6xf32>, vector<6x128xf32>, vector<60x128xf32> -> vector<60x128xf32>
    %4 = vector.broadcast %2 : vector<60x1xf32> to vector<60x128xf32>
    %5 = arith.addf %3, %4 : vector<60x128xf32>
    %cst_5 = arith.constant 0.000000e+00 : f32
    %6 = vector.broadcast %cst_5 : f32 to vector<60x128xf32>
    %7 = arith.maximumf %5, %6 : vector<60x128xf32>
    %c64 = arith.constant 64 : index
    %c0_6 = arith.constant 0 : index
    %8 = vector.load %arg2[%c64, %c0_6] : memref<112x64xf32, #tpu.memory_space<vmem>>, vector<24x60xf32>
    %c64_7 = arith.constant 64 : index
    %c0_8 = arith.constant 0 : index
    %9 = vector.load %arg3[%c64_7, %c0_8] : memref<112x1xf32, #tpu.memory_space<vmem>>, vector<24x1xf32>
    %cst_9 = arith.constant dense<0.000000e+00> : vector<24x128xf32>
    %10 = tpu.matmul %8, %7, %cst_9 {dimension_numbers = #tpu.dot_dimension_numbers<[1], [0], [0], [1], [0, 0, 1, 1], [], []>} : vector<24x60xf32>, vector<60x128xf32>, vector<24x128xf32> -> vector<24x128xf32>
    %11 = vector.broadcast %9 : vector<24x1xf32> to vector<24x128xf32>
    %12 = arith.addf %10, %11 : vector<24x128xf32>
    %cst_10 = arith.constant 0.000000e+00 : f32
    %13 = vector.broadcast %cst_10 : f32 to vector<24x128xf32>
    %14 = arith.maximumf %12, %13 : vector<24x128xf32>
    %c88 = arith.constant 88 : index
    %c0_11 = arith.constant 0 : index
    %15 = vector.load %arg2[%c88, %c0_11] : memref<112x64xf32, #tpu.memory_space<vmem>>, vector<24x1xf32>
    %c88_12 = arith.constant 88 : index
    %c0_13 = arith.constant 0 : index
    %16 = vector.load %arg3[%c88_12, %c0_13] : memref<112x1xf32, #tpu.memory_space<vmem>>, vector<1x1xf32>
    %17 = vector.broadcast %15 : vector<24x1xf32> to vector<24x128xf32>
    %18 = arith.mulf %17, %14 : vector<24x128xf32>
    %cst_14 = arith.constant dense<0.000000e+00> : vector<128xf32>
    %19 = vector.multi_reduction <add>, %18, %cst_14 [0] : vector<24x128xf32> to vector<128xf32>
    %20 = vector.shape_cast %19 : vector<128xf32> to vector<1x128xf32>
    %21 = vector.broadcast %16 : vector<1x1xf32> to vector<1x128xf32>
    %22 = arith.addf %20, %21 : vector<1x128xf32>
    %cst_15 = arith.constant 0.000000e+00 : f32
    %23 = vector.broadcast %cst_15 : f32 to vector<1x128xf32>
    %24 = arith.maximumf %22, %23 : vector<1x128xf32>
    %c0_16 = arith.constant 0 : index
    %c0_17 = arith.constant 0 : index
    %25 = vector.load %arg4[%c0_16, %c0_17] : memref<1x128xf32, #tpu.memory_space<vmem>>, vector<1x128xf32>
    tpu.vector_store %arg4[%c0_16, %c0_17], %24 {strides = array<i32>} : memref<1x128xf32, #tpu.memory_space<vmem>>, vector<1x128xf32>,
    return
  }
  func.func @transform_0(%arg0: i32) -> (i32, i32) {
    %c0_i32 = arith.constant 0 : i32
    %c0_i32_0 = arith.constant 0 : i32
    return %c0_i32, %arg0 : i32, i32
  }
  func.func @transform_1(%arg0: i32) -> (i32, i32) {
    %c0_i32 = arith.constant 0 : i32
    %c0_i32_0 = arith.constant 0 : i32
    %c0_i32_1 = arith.constant 0 : i32
    return %c0_i32, %c0_i32_0 : i32, i32
  }
  func.func @transform_2(%arg0: i32) -> (i32, i32) {
    %c0_i32 = arith.constant 0 : i32
    %c0_i32_0 = arith.constant 0 : i32
    %c0_i32_1 = arith.constant 0 : i32
    return %c0_i32, %c0_i32_0 : i32, i32
  }
  func.func @transform_3(%arg0: i32) -> (i32, i32) {
    %c0_i32 = arith.constant 0 : i32
    %c0_i32_0 = arith.constant 0 : i32
    return %c0_i32, %arg0 : i32, i32
  }
}

</mosaic_0001>

<bundles_post_ra>
// kernel: tpu_custom_call.1
= control target key start
LH: loop header
LB: loop body
LE: loop exit
PB: predicated region body
PF: predicated region fallthrough
CT: control target
= control target key end

     0   :  { %vm97_vm0 = vcmask 1045504   ;;  %vm72_vm1 = vcmask 48128   ;;  %v509_v4 = vmov 0   ;;  %s639_s0 = inlined_call_operand.vmem [shape: f32[6,128], index: 0, kind: input, shape index: {}]   ;;  %s640_s1 = inlined_call_operand.vmem [shape: f32[112,64], index: 1, kind: input, shape index: {}]   ;;  %s641_s2 = inlined_call_operand.vmem [shape: f32[112,1], index: 2, kind: input, shape index: {}]   ;;  %s642_s3 = inlined_call_operand.hbm [shape: f32[1,128], index: 3, kind: output, shape index: {}]  }
   0x1   :  { %v15_v0 = vld [vmem:[%s639_s0] sm:$0x3f]  ;;  %v17_v2 = vld [vmem:[%s640_s1 + $0x8] sm:$0xff]  ;;  %v18_v3 = vld [vmem:[%s640_s1 + $0x10] sm:$0xff]  ;;  %483 = vset.pattern.permute.xlu0 %v509_v4  ;;  %484 = vset.pattern.permute.xlu1 %v509_v4 }
   0x2   :  { %v16_v1 = vld [vmem:[%s640_s1] sm:$0xff]  ;;  %417 = vmatprep.subr.msk.mxu0 %vm97_vm0, %v15_v0  ;;  %v26_v6 = vld [vmem:[%s641_s2 + $0x10] sm:$0xff]  ;;  %v19_v7 = vld [vmem:[%s640_s1 + $0x18] sm:$0xff] }
   0x3   :  { %419 = vmatprep.mubr.msk.f32.mxu0 %vm72_vm1, %v16_v1  ;;  %418 = vmatpush3.msk.msra.mxu0 %vm97_vm0, %v15_v0  ;;  %v24_v5 = vld [vmem:[%s641_s2] sm:$0xff]  ;;  %v25_v9 = vld [vmem:[%s641_s2 + $0x8] sm:$0xff]  ;;  %v27_v10 = vld [vmem:[%s641_s2 + $0x18] sm:$0xff] }
   0x4   :  { %420 = vmatmul.mubr.msk.f32.vlgmr.msra.gmra.mrb[0].mxu0 %vm72_vm1, %v17_v2  ;;  %34 = vperm.xlu0 %483, %v24_v5   ;;  %v20_v8 = vld [vmem:[%s640_s1 + $0x20] sm:$0xff]  ;;  %v21_v11 = vld [vmem:[%s640_s1 + $0x28] sm:$0xff] }
   0x5   :  { %422 = vmatprep.mubr.msk.f32.mxu0 %vm72_vm1, %v18_v3  ;;  %44 = vperm.xlu1 %484, %v26_v6  }
   0x8   :  { %423 = vmatmul.mubr.msk.f32.gmra.mrb[2].mxu0 %vm72_vm1, %v19_v7  ;;  %39 = vperm.xlu0 %483, %v25_v9  }
   0x9   :  { %425 = vmatprep.mubr.msk.f32.mxu0 %vm72_vm1, %v20_v8 }
   0xa   :  { %8 = vsyncpa [#allocation3], 0  ;;  %v22_v12 = vld [vmem:[%s640_s1 + $0x30] sm:$0xff]  ;;  %v28_v13 = vld [vmem:[%s641_s2 + $0x20] sm:$0xff]  ;;  %49 = vperm.xlu1 %484, %v27_v10   ;;  %v510_v25 = vmov 0.0|0.0   ;;  %vm511_vm2 = vmmov 0  }
   0xb   :  { %v29_v14 = vld [vmem:[%s641_s2 + $0x28] sm:$0xff]  ;;  %v23_v15 = vld [vmem:[%s640_s1 + $0x38] sm:$0xf]  ;;  %v30_v16 = vld [vmem:[%s641_s2 + $0x30] sm:$0xff]  ;;  %456 = vmatprep.subr.bf16.mxu0 %v510_v25  ;;  %469 = vmatprep.subr.bf16.mxu1 %v510_v25  ;;  %v512_v26 = vmov 0.0   ;;  %vm245_vm3 = vcmask 1043456  }
   0xc   :  { %426 = vmatmul.mubr.msk.f32.gmra.mrb[4].mxu0 %vm72_vm1, %v21_v11  ;;  %54 = vperm.xlu0 %483, %v28_v13   ;;  %v31_v17 = vld [vmem:[%s641_s2 + $0x38] sm:$0xf]  ;;  %v217_v18 = vld [vmem:[%s641_s2 + $0x40] sm:$0xff]  ;;  %v218_v19 = vld [vmem:[%s641_s2 + $0x48] sm:$0xff]  ;;  %vm513_vm4 = vmmov 1   ;;  %vm235_vm6 = vcmask 490496  }
   0xd   :  { %428 = vmatprep.mubr.msk.f32.mxu0 %vm72_vm1, %v22_v12  ;;  %v219_v20 = vld [vmem:[%s641_s2 + $0x50] sm:$0xff]  ;;  %v332_v21 = vld [vmem:[%s640_s1 + $0x58] sm:$0xff]  ;;  %v333_v22 = vld [vmem:[%s640_s1 + $0x60] sm:$0xff]  ;;  %450 = vmatprep.mubr.msk.f32.mxu1 %vm511_vm2, %v512_v26 }
   0xe   :  { %59 = vperm.xlu1 %484, %v29_v14   ;;  %v334_v23 = vld [vmem:[%s640_s1 + $0x68] sm:$0xff]  ;;  %v335_v24 = vld [vmem:[%s641_s2 + $0x58] sm:$0x1]  ;;  %vm467_vm5 = vmpackc.low %vm245_vm3, %vm513_vm4 }
   0xf   :  { %v214_v63 = vld [vmem:[%s640_s1 + $0x40] sm:$0xff]  ;;  %v215_v0 = vld [vmem:[%s640_s1 + $0x48] sm:$0xff]  ;;  %v216_v1 = vld [vmem:[%s640_s1 + $0x50] sm:$0xff]  ;;  %s514_s1 = smov [#allocation2]  }
  0x10   :  { %429 = vmatmul.mubr.msk.f32.gmra.mrb[6].mxu0 %vm72_vm1, %v23_v15  ;;  %64 = vperm.xlu0 %483, %v30_v16   ;;  %s376_s9 = sshll.u32 %s514_s1, 4  ;;  %s377_s9 = int_to_ptr.vmem [resolvable:$true] %s376_s9 }
  0x11   :  { %447 = vmatprep.mubr.msk.f32.mxu0 %vm511_vm2, %v512_v26  ;;  %s485_s10 = scalar_lea.vmem %s377_s9, 16  ;;  %s489_s11 = scalar_lea.vmem %s377_s9, 32 }
  0x12   :  { %69 = vperm.xlu1 %484, %v31_v17   ;;  %p486_p0 = scmp.ne.s32.totalorder %s377_s9, %s485_s10  ;;  %p490_p1 = scmp.lt.s32.totalorder %s377_s9, %s377_s9 }
  0x13   :  { %p491_p2 = scmp.lt.s32.totalorder %s489_s11, %s485_s10 }
  0x14   :  { %222 = vperm.xlu0 %483, %v217_v18  }
  0x15   :  { %p492_p3 = por %p491_p2, %p490_p1 }
  0x16   :  { %227 = vperm.xlu1 %484, %v218_v19  }
  0x17   :  { %p493_p4 = pnand %p492_p3, %p486_p0 }
  0x18   :  { %232 = vperm.xlu0 %483, %v219_v20  }
  0x1a   :  { %338 = vperm.xlu1 %484, %v332_v21  }
  0x1c   :  { %343 = vperm.xlu0 %483, %v333_v22  }
  0x1e   :  { %348 = vperm.xlu1 %484, %v334_v23  }
  0x20   :  { %364 = vperm.xlu0 %483, %v335_v24  }
  0x83   :  { %v35_v27 = vpop.permute.xlu0 %34 }
  0x84   :  { %v45_v28 = vpop.permute.xlu1 %44 }
  0x87   :  { %v40_v29 = vpop.permute.xlu0 %39 }
  0x89   :  { %v50_v30 = vpop.permute.xlu1 %49 }
  0x8b   :  { %v55_v43 = vpop.permute.xlu0 %54 }
  0x8d   :  { %v60_v40 = vpop.permute.xlu1 %59 }
  0x8f   :  { %v65_v55 = vpop.permute.xlu0 %64 }
  0x91   :  { %v70_v52 = vpop.permute.xlu1 %69 }
  0x93   :  { %v223_v2 = vpop.permute.xlu0 %222 }
  0x95   :  { %v228_v3 = vpop.permute.xlu1 %227 }
  0x97   :  { %v233_v4 = vpop.permute.xlu0 %232 }
  0x99   :  { %v339_v11 = vpop.permute.xlu1 %338 }
  0x9b   :  { %v344_v14 = vpop.permute.xlu0 %343 }
  0x9d   :  { %v349_v22 = vpop.permute.xlu1 %348 }
  0xd7   :  { %v421_v31 = vpop.f32.mrb[0].mxu0 }
  0xd8   :  { %v173_v32 = vadd.f32 %v421_v31, %v40_v29  ;;  %v167_v33 = vpop.f32.mrb[1].mxu0  ;;  %v365_v31 = vpop.permute.xlu0 %364 }
  0xd9   :  { %v168_v34 = vadd.f32 %v167_v33, %v35_v27 }
  0xda   :  { %v207_v35 = vmax.f32 %v173_v32, 0.0 }
  0xdb   :  { %v206_v36 = vmax.f32 %v168_v34, 0.0  ;;  %v424_v37 = vpop.f32.mrb[2].mxu0 }
  0xdc   :  { %v183_v38 = vadd.f32 %v424_v37, %v50_v30  ;;  %v177_v39 = vpop.f32.mrb[3].mxu0 }
  0xdd   :  { %v457_v41 = vpack.c.bf16 %v207_v35, %v206_v36  ;;  %v178_v42 = vadd.f32 %v177_v39, %v45_v28 }
  0xde   :  { %v209_v44 = vmax.f32 %v183_v38, 0.0 }
  0xdf   :  { %v208_v45 = vmax.f32 %v178_v42, 0.0  ;;  %v427_v46 = vpop.f32.mrb[4].mxu0  ;;  %458 = vmatpush3.bf16.msra.mxu0 %v457_v41  ;;  %473 = vmatpush3.bf16.msra.mxu1 %v457_v41 }
  0xe0   :  { %v193_v47 = vadd.f32 %v427_v46, %v60_v40  ;;  %v187_v48 = vpop.f32.mrb[5].mxu0  ;;  %459 = vmatprep.subr.bf16.mxu0 %v510_v25  ;;  %470 = vmatprep.subr.bf16.mxu1 %v510_v25 }
  0xe1   :  { %v460_v49 = vpack.c.bf16 %v209_v44, %v208_v45  ;;  %v188_v50 = vadd.f32 %v187_v48, %v55_v43 }
  0xe2   :  { %v211_v51 = vmax.f32 %v193_v47, 0.0 }
  0xe3   :  { %v210_v53 = vmax.f32 %v188_v50, 0.0  ;;  %v430_v54 = vpop.f32.mrb[6].mxu0  ;;  %461 = vmatpush3.bf16.msra.mxu0 %v460_v49  ;;  %474 = vmatpush3.bf16.msra.mxu1 %v460_v49 }
  0xe4   :  { %v203_v56 = vadd.f32 %v430_v54, %v70_v52  ;;  %v197_v57 = vpop.f32.mrb[7].mxu0  ;;  %462 = vmatprep.subr.bf16.mxu0 %v510_v25  ;;  %471 = vmatprep.subr.bf16.mxu1 %v510_v25 }
  0xe5   :  { %v463_v58 = vpack.c.bf16 %v211_v51, %v210_v53  ;;  %v198_v59 = vadd.f32 %v197_v57, %v65_v55 }
  0xe6   :  { %v213_v60 = vmax.f32 %v203_v56, 0.0 }
  0xe7   :  { %v212_v61 = vmax.f32 %v198_v59, 0.0  ;;  %464 = vmatpush3.bf16.msra.mxu0 %v463_v58  ;;  %475 = vmatpush3.bf16.msra.mxu1 %v463_v58 }
  0xe8   :  { %465 = vmatprep.subr.bf16.mxu0 %v510_v25  ;;  %472 = vmatprep.subr.bf16.mxu1 %v510_v25 }
  0xe9   :  { %v466_v62 = vpack.c.bf16 %v213_v60, %v212_v61 }
  0xeb   :  { %468 = vmatpush3.bf16.msk.msra.mxu0 %vm467_vm5, %v466_v62  ;;  %476 = vmatpush3.bf16.msk.msra.mxu1 %vm467_vm5, %v466_v62 }
  0xee   :  { %448 = vmatmul.mubr.msk.f32.vlgmr.msra.gmra.mrb[8].mxu0 %vm235_vm6, %v214_v63  ;;  %451 = vmatmul.mubr.msk.f32.vlgmr.msra.gmra.mrb[0].mxu1 %vm235_vm6, %v215_v0 }
  0xef   :  { %453 = vmatprep.mubr.msk.f32.mxu1 %vm511_vm2, %v512_v26 }
  0xf2   :  { %454 = vmatmul.mubr.msk.f32.gmra.mrb[2].mxu1 %vm235_vm6, %v216_v1 }
 0x1c1   :  { %v315_v5 = vpop.f32.mrb[8].mxu0  ;;  %v320_v6 = vpop.f32.mrb[0].mxu1 }
 0x1c2   :  { %v316_v7 = vadd.f32 %v315_v5, %v223_v2  ;;  %v321_v8 = vadd.f32 %v320_v6, %v228_v3  ;;  %v452_v9 = vpop.f32.mrb[1].mxu1  ;;  %v449_v10 = vpop.f32.mrb[9].mxu0 }
 0x1c4   :  { %v329_v12 = vmax.f32 %v316_v7, 0.0  ;;  %v330_v13 = vmax.f32 %v321_v8, 0.0 }
 0x1c5   :  { %v325_v15 = vpop.f32.mrb[2].mxu1 }
 0x1c6   :  { %v351_v16 = vmul.f32 %v339_v11, %v329_v12  ;;  %v352_v17 = vmul.f32 %v344_v14, %v330_v13  ;;  %v326_v18 = vadd.f32 %v325_v15, %v233_v4  ;;  %v455_v19 = vpop.f32.mrb[3].mxu1 }
 0x1c8   :  { %v354_v20 = vadd.f32 %v352_v17, %v351_v16  ;;  %v331_v21 = vmax.f32 %v326_v18, 0.0 }
 0x1ca   :  { %v353_v23 = vmul.f32 %v349_v22, %v331_v21 }
 0x1cc   :  { %v355_v24 = vadd.f32 %v354_v20, %v353_v23 }
 0x1ce   :  { %v356_v25 = vrot.slane %v355_v24, 4 }
 0x1d0   :  { %v357_v26 = vadd.f32 %v356_v25, %v355_v24 }
 0x1d2   :  { %v358_v27 = vrot.slane %v357_v26, 2 }
 0x1d4   :  { %v359_v28 = vadd.f32 %v358_v27, %v357_v26 }
 0x1d6   :  { %v360_v29 = vrot.slane %v359_v28, 1 }
 0x1d8   :  { %v361_v30 = vadd.f32 %v360_v29, %v359_v28 }
 0x1da   :  { %v367_v32 = vadd.f32 %v365_v31, %v361_v30 }
 0x1dc   :  { %v368_v33 = vmax.f32 %v367_v32, 0.0 }
 0x1de   :  { %369 = vst [vmem:[#allocation2] sm:$0x1] %v368_v33 }
 0x1df   :  { %496 = shalt.err (!%p493_p4)
}
 0x1e0   :  { %s497_s14 = scalar_lea.hbm %s642_s3, 16 }
 0x1e1   :  { %p498_p5 = scmp.ne.s32.totalorder %s642_s3, %s497_s14  ;;  %p501_p6 = scmp.lt.u32.totalorder %s497_s14, %s642_s3 }
 0x1e3   :  { %p503_p7 = pnand %p501_p6, %p498_p5 }
 0x1e5   :  { %506 = shalt.err (!%p503_p7)
}
 0x1e6   :  { %379 = dma.vmem_to_hbm [thread:$0]  %s377_s9, 16, %s642_s3, [#allocation3]  }
 0x1e7   :  { %507 = dma.done.wait [#allocation3], 16  }
 0x1e8   :  { %508 = vsyncadd [#allocation3], 4294967280 }
 0x1e9   :  { %383 = vsyncpa [#allocation3], 1 }

</bundles_post_ra>
